<compile_context>
chip_gen: v7x
topology: tpu7x:2x2x1
jax: 0.10.0
libtpu: 0.0.40
codegen_flags: <defaults>
</compile_context>

<pallas_src>
import jax
import jax.numpy as jnp
from jax.experimental import pallas as pl
from jax.experimental.pallas import tpu as pltpu

_LANE = 128     # last dim pads to 128 lanes in VMEM / vregs
_SUBLANE = 8    # second-to-last dim granularity


def _round_up(v, m):
    return (v + m - 1) // m * m


def _matmul_kernel(x_ref, w_ref, o_ref):
    # Single MXU matmul with the registered parameter weight1 (f32 accumulate,
    # result stored in the caller's dtype).
    o_ref[...] = jnp.dot(
        x_ref[...], w_ref[...], preferred_element_type=jnp.float32
    ).astype(o_ref.dtype)


def mymodel_forward(x, weight1, weight2=None, *, block_b=8192):
    # weight2 mirrors the module's plain (non-parameter) tensor. forward()
    # never reads it, so it is deliberately NOT routed into the kernel.
    del weight2

    B, F = x.shape
    Fi, Fo = weight1.shape
    assert F == Fi

    out_dtype = x.dtype  # output follows the input dtype (MXU accumulates f32)
    x_item = jnp.dtype(x.dtype).itemsize
    w_item = jnp.dtype(weight1.dtype).itemsize
    o_item = jnp.dtype(out_dtype).itemsize

    cost = pl.CostEstimate(
        flops=2 * B * F * Fo,
        transcendentals=0,
        bytes_accessed=B * F * x_item + Fi * Fo * w_item + B * Fo * o_item,
    )
    out_shape = jax.ShapeDtypeStruct((B, Fo), out_dtype)

    # VMEM footprint helpers (last dim pads to 128 lanes).
    x_row_bytes = _round_up(F, _LANE) * x_item
    o_row_bytes = _round_up(Fo, _LANE) * o_item
    w_bytes = _round_up(Fi, _SUBLANE) * _round_up(Fo, _LANE) * w_item

    if B <= block_b:
        # Small / mid batch: no grid, no pipeline machinery — operands live in
        # VMEM, one MXU matmul, one store.
        needed = _round_up(B, _SUBLANE) * (x_row_bytes + o_row_bytes) + w_bytes
        vmem_limit = int(min(max(needed + (1 << 20), 16 << 20), 64 << 20))
        return pl.pallas_call(
            _matmul_kernel,
            out_shape=out_shape,
            in_specs=[
                pl.BlockSpec(memory_space=pltpu.MemorySpace.VMEM),
                pl.BlockSpec(memory_space=pltpu.MemorySpace.VMEM),
            ],
            out_specs=pl.BlockSpec(memory_space=pltpu.MemorySpace.VMEM),
            compiler_params=pltpu.CompilerParams(vmem_limit_bytes=vmem_limit),
            cost_estimate=cost,
        )(x, weight1)

    # Large batch: tile over B only. weight1's constant index_map keeps the
    # tiny weight VMEM-resident across the whole grid; "parallel" lets v7x's
    # dual TensorCores split the batch (neutral on v5e/v6e).
    block_b = _round_up(min(block_b, B), _SUBLANE)
    steps = pl.cdiv(B, block_b)
    if steps > 1 and steps % 2 == 1:
        # Prefer an even step count so both v7x TensorCores get work.
        steps += 1
        block_b = _round_up(pl.cdiv(B, steps), _SUBLANE)
        steps = pl.cdiv(B, block_b)

    # Double-buffered x + out tiles + weight + slack; scale the scoped limit.
    tile_bytes = block_b * (x_row_bytes + o_row_bytes)
    needed = 2 * tile_bytes + 2 * w_bytes + (2 << 20)
    vmem_limit = int(min(max(needed, 32 << 20), 64 << 20))

    return pl.pallas_call(
        _matmul_kernel,
        out_shape=out_shape,
        grid=(steps,),
        in_specs=[
            pl.BlockSpec((block_b, F), lambda i: (i, 0)),
            pl.BlockSpec((Fi, Fo), lambda i: (0, 0)),
        ],
        out_specs=pl.BlockSpec((block_b, Fo), lambda i: (i, 0)),
        compiler_params=pltpu.CompilerParams(
            dimension_semantics=("parallel",),
            vmem_limit_bytes=vmem_limit,
        ),
        cost_estimate=cost,
    )(x, weight1)


if __name__ == "__main__":
    key = jax.random.PRNGKey(0)
    k_x, k_w1, k_w2, k_xl = jax.random.split(key, 4)

    # Module __init__: torch.rand(20, 20) -> uniform [0, 1)
    weight1 = jax.random.uniform(k_w1, (20, 20), dtype=jnp.float32)  # nn.Parameter
    weight2 = jax.random.uniform(k_w2, (20, 20), dtype=jnp.float32)  # plain tensor (unused)

    # Small batch consistent with the 20-wide feature dim implied by weight1.
    x = jax.random.uniform(k_x, (8, 20), dtype=jnp.float32)

    out = mymodel_forward(x, weight1, weight2)
    jax.block_until_ready(out)
    ref = x @ weight1
    assert out.shape == (8, 20)
    assert out.dtype == x.dtype
    assert jnp.allclose(out, ref, atol=1e-5, rtol=1e-5)

    # Also exercise the batch-tiled path (small block_b forces a multi-step,
    # even-count grid; weight stays VMEM-resident across the grid).
    x_large = jax.random.uniform(k_xl, (1024, 20), dtype=jnp.float32)
    out_large = mymodel_forward(x_large, weight1, weight2, block_b=256)
    jax.block_until_ready(out_large)
    ref_large = x_large @ weight1
    assert out_large.shape == (1024, 20)
    assert jnp.allclose(out_large, ref_large, atol=1e-5, rtol=1e-5)

    print("KERNEL_OK")
</pallas_src>

<mosaic_0001>
module attributes {stable_mosaic.version = 11 : i64} {
  func.func @_matmul_kernel(%arg0: memref<8x20xf32, #tpu.memory_space<vmem>>, %arg1: memref<20x20xf32, #tpu.memory_space<vmem>>, %arg2: memref<8x20xf32, #tpu.memory_space<vmem>>) attributes {dimension_semantics = [], scalar_prefetch = 0 : i64, scratch_operands = 0 : i64, tpu.core_type = #tpu.core_type<tc>} {
    %c0 = arith.constant 0 : index
    %c0_0 = arith.constant 0 : index
    %0 = vector.load %arg0[%c0, %c0_0] : memref<8x20xf32, #tpu.memory_space<vmem>>, vector<8x20xf32>
    %c0_1 = arith.constant 0 : index
    %c0_2 = arith.constant 0 : index
    %1 = vector.load %arg1[%c0_1, %c0_2] : memref<20x20xf32, #tpu.memory_space<vmem>>, vector<20x20xf32>
    %cst = arith.constant dense<0.000000e+00> : vector<8x20xf32>
    %2 = tpu.matmul %0, %1, %cst {dimension_numbers = #tpu.dot_dimension_numbers<[1], [0], [0], [1], [0, 0, 1, 1], [], []>} : vector<8x20xf32>, vector<20x20xf32>, vector<8x20xf32> -> vector<8x20xf32>
    %c0_3 = arith.constant 0 : index
    %c0_4 = arith.constant 0 : index
    %3 = vector.load %arg2[%c0_3, %c0_4] : memref<8x20xf32, #tpu.memory_space<vmem>>, vector<8x20xf32>
    tpu.vector_store %arg2[%c0_3, %c0_4], %2 {strides = array<i32>} : memref<8x20xf32, #tpu.memory_space<vmem>>, vector<8x20xf32>,
    return
  }
}

</mosaic_0001>

<bundles_post_ra>
// kernel: tpu_custom_call.1
= control target key start
LH: loop header
LB: loop body
LE: loop exit
PB: predicated region body
PF: predicated region fallthrough
CT: control target
= control target key end

     0   :  { %7 = vsyncpa [#allocation3], 0  ;;  %s301_s0 = inlined_call_operand.hbm [shape: f32[8,20], index: 0, kind: input, shape index: {}]   ;;  %s302_s1 = inlined_call_operand.hbm [shape: f32[20,20], index: 1, kind: input, shape index: {}]   ;;  %s303_s2 = inlined_call_operand.hbm [shape: f32[8,20], index: 2, kind: output, shape index: {}]  }
   0x1   :  { %8 = vsyncpa [#allocation6], 0 }
   0x2   :  { %9 = vsyncpa [#allocation4], 0  ;;  %s235_s9 = smov [#allocation2]   ;;  %s236_s11 = smov [#allocation5]  }
   0x3   :  { %s16_s10 = sshll.u32 %s235_s9, 4  ;;  %s25_s12 = sshll.u32 %s236_s11, 4  ;;  %s17_s10 = int_to_ptr.vmem [resolvable:$true] %s16_s10  ;;  %s258_s12 = int_to_ptr.vmem [resolvable:$true] %s25_s12 }
   0x4   :  { %s163_s15 = scalar_lea.hbm %s301_s0, 128 }
   0x5   :  { %p164_p0 = scmp.ne.s32.totalorder %s301_s0, %s163_s15  ;;  %p167_p1 = scmp.lt.u32.totalorder %s163_s15, %s301_s0 }
   0x7   :  { %p169_p2 = pnand %p167_p1, %p164_p0 }
   0x9   :  { %172 = shalt.err (!%p169_p2)
}
   0xa   :  { %s173_s20 = scalar_lea.vmem %s17_s10, 128  ;;  %p178_p4 = scmp.lt.s32.totalorder %s17_s10, %s17_s10 }
   0xb   :  { %p174_p3 = scmp.ne.s32.totalorder %s17_s10, %s173_s20  ;;  %p179_p5 = scmp.lt.s32.totalorder %s173_s20, %s173_s20 }
   0xd   :  { %p180_p6 = por %p179_p5, %p178_p4 }
   0xf   :  { %p181_p7 = pnand %p180_p6, %p174_p3 }
  0x11   :  { %184 = shalt.err (!%p181_p7)
}
  0x12   :  { %19 = dma.hbm_to_vmem [thread:$0]  %s301_s0, 128, %s17_s10, [#allocation3]  }
  0x13   :  { %s185_s25 = scalar_lea.hbm %s302_s1, 384 }
  0x14   :  { %p186_p8 = scmp.ne.s32.totalorder %s302_s1, %s185_s25  ;;  %p189_p9 = scmp.lt.u32.totalorder %s185_s25, %s302_s1 }
  0x16   :  { %p191_p10 = pnand %p189_p9, %p186_p8 }
  0x18   :  { %194 = shalt.err (!%p191_p10)
}
  0x19   :  { %s195_s30 = scalar_lea.vmem %s258_s12, 384  ;;  %p200_p12 = scmp.lt.s32.totalorder %s258_s12, %s258_s12 }
  0x1a   :  { %p196_p11 = scmp.ne.s32.totalorder %s258_s12, %s195_s30  ;;  %p201_p13 = scmp.lt.s32.totalorder %s195_s30, %s195_s30 }
  0x1c   :  { %p202_p0 = por %p201_p13, %p200_p12 }
  0x1e   :  { %p203_p1 = pnand %p202_p0, %p196_p11 }
  0x20   :  { %206 = shalt.err (!%p203_p1)
}
  0x21   :  { %s237_s0 = smov 128   ;;  %s238_s3 = smov 8  }
  0x22   :  { %31 = dma.hbm_to_vmem [thread:$0]  %s302_s1, 384, %s258_s12, [#allocation6], %s237_s0, %s237_s0, %s238_s3  }
  0x23   :  { %229 = dma.done.wait [#allocation3], 128  }
  0x24   :  { %230 = vsyncadd [#allocation3], 4294967168 }
  0x25   :  { %231 = dma.done.wait [#allocation6], 384  }
  0x26   :  { %232 = vsyncadd [#allocation6], 4294966912  ;;  %v239_v0 = vmov 0.0|0.0   ;;  %vm240_vm0 = vmmov 0   ;;  %v241_v1 = vmov 0.0   ;;  %v39_v2 = vld [vmem:[#allocation5] sm:$0xff] }
  0x27   :  { %152 = vmatprep.subr.bf16.mxu0 %v239_v0  ;;  %149 = vmatprep.mubr.msk.f32.mxu0 %vm240_vm0, %v241_v1  ;;  %v40_v3 = vld [vmem:[#allocation5 + $0x8] sm:$0xff]  ;;  %v41_v5 = vld [vmem:[#allocation5 + $0x10] sm:$0xf]  ;;  %vm46_vm1 = vcmask 1043456   ;;  %v38_v6 = vld [vmem:[#allocation2] sm:$0xff]  ;;  %vm42_vm2 = vcmask 162816  }
  0x28   :  { %v153_v4 = vpack.c.bf16 %v40_v3, %v39_v2  ;;  %s242_s1 = smov [#allocation7]  }
  0x29   :  { %s127_s6 = sshll.u32 %s242_s1, 4  ;;  %s128_s6 = int_to_ptr.vmem [resolvable:$true] %s127_s6 }
  0x2a   :  { %154 = vmatpush3.bf16.msra.mxu0 %v153_v4  ;;  %s207_s7 = scalar_lea.vmem %s128_s6, 128  ;;  %p212_p3 = scmp.lt.s32.totalorder %s128_s6, %s128_s6 }
  0x2b   :  { %147 = vmatprep.subr.mxu0 %v241_v1  ;;  %p208_p2 = scmp.ne.s32.totalorder %s128_s6, %s207_s7  ;;  %p213_p4 = scmp.lt.s32.totalorder %s207_s7, %s207_s7 }
  0x2d   :  { %p214_p5 = por %p213_p4, %p212_p3 }
  0x2e   :  { %148 = vmatpush3.msk.msra.mxu0 %vm46_vm1, %v41_v5 }
  0x2f   :  { %150 = vmatmul.mubr.msk.f32.vlgmr.msra.gmra.mrb[0].mxu0 %vm42_vm2, %v38_v6  ;;  %p215_p6 = pnand %p214_p5, %p208_p2 }
 0x102   :  { %v116_v7 = vpop.f32.mrb[0].mxu0 }
 0x103   :  { %120 = vst.msk [vmem:[#allocation7] sm:$0xff] %vm42_vm2, %v116_v7  ;;  %v151_v8 = vpop.f32.mrb[1].mxu0 }
 0x104   :  { %218 = shalt.err (!%p215_p6)
}
 0x105   :  { %s219_s10 = scalar_lea.hbm %s303_s2, 128 }
 0x106   :  { %p220_p7 = scmp.ne.s32.totalorder %s303_s2, %s219_s10  ;;  %p223_p8 = scmp.lt.u32.totalorder %s219_s10, %s303_s2 }
 0x108   :  { %p225_p9 = pnand %p223_p8, %p220_p7 }
 0x10a   :  { %228 = shalt.err (!%p225_p9)
}
 0x10b   :  { %130 = dma.vmem_to_hbm [thread:$0]  %s128_s6, 128, %s303_s2, [#allocation4]  }
 0x10c   :  { %233 = dma.done.wait [#allocation4], 128  }
 0x10d   :  { %234 = vsyncadd [#allocation4], 4294967168 }
 0x10e   :  { %134 = vsyncpa [#allocation3], 1 }
 0x10f   :  { %135 = vsyncpa [#allocation6], 1 }
 0x110   :  { %136 = vsyncpa [#allocation4], 1 }

</bundles_post_ra>
